<compile_context>
chip_gen: v5e
topology: v5e:2x2
jax: 0.10.0
libtpu: 0.0.40
codegen_flags: <defaults>
</compile_context>

<pallas_src>
from functools import partial

import jax
import jax.numpy as jnp
from jax.experimental import pallas as pl
from jax.experimental.pallas import tpu as pltpu


# ---------------------------------------------------------------------------
# Pass 1:  h1_aug^T = [E | 1]^T @ A^T  ->  fst_aug^T = [A@E - E | order]^T
#          (emitted both as f32 and as the bf16 LHS for the second SpMM)
# ---------------------------------------------------------------------------
def _pass1_kernel(at_ref, e_aug16_ref, e_pad32_ref, fo32_ref, fo16_ref):
    # at_ref:      (Np, TM) int8  A^T column tile (0/1, exact)
    # e_aug16_ref: (D1, Np) bf16  resident [E | 1]^T  (matmul LHS)
    # e_pad32_ref: (D1, TM) f32   tile     [E | 0]^T  (elementwise subtract)
    a16 = at_ref[...].astype(jnp.bfloat16)          # VPU upcast, overlaps MXU
    h1 = jnp.dot(e_aug16_ref[...], a16,
                 preferred_element_type=jnp.float32)  # (D1, TM) = [A@E | order]^T
    fo = h1 - e_pad32_ref[...]                        # [fst | order]^T
    fo32_ref[...] = fo
    fo16_ref[...] = fo.astype(jnp.bfloat16)


# ---------------------------------------------------------------------------
# Pass 2:  h2_aug^T = fst_aug^T @ A^T  ->  subgraph embed, cosine, +Gumbel
# ---------------------------------------------------------------------------
def _pass2_kernel(at_ref, fo16_ref, fo32_ref, e_pad_ref, einv_ref, g_ref,
                  out_ref):
    # at_ref:   (Np, TM) int8  A^T column tile
    # fo16_ref: (D1, Np) bf16  resident [fst | order]^T  (matmul LHS)
    # fo32_ref: (D1, TM) f32   tile     [fst | order]^T
    # e_pad_ref:(D1, TM) f32   tile     [E | 0]^T
    # einv_ref: (1,  TM) f32   precomputed 1 / max(||E_i||, 1e-12)
    # g_ref:    (1,  TM) f32   precomputed Gumbel noise
    a16 = at_ref[...].astype(jnp.bfloat16)
    h2 = jnp.dot(fo16_ref[...], a16,
                 preferred_element_type=jnp.float32)  # (D1, TM) = [A@fst | A@order]^T

    fo = fo32_ref[...]
    ep = e_pad_ref[...]
    d = fo.shape[0] - 1                               # index of the degree row

    order = fo[d:d + 1, :]                            # (1, TM)   node degrees
    a_order = h2[d:d + 1, :]                          # (1, TM)   A @ order

    # Rows < D hold the real quantities; row D is junk and is excluded below.
    scd = h2 - fo - order * ep                        # scdEmbeds in rows < D

    # fstNum + scdNum + 1e-8 = order + (A@order - 2*order) + 1e-8.
    # denom > 0 is guaranteed: allOneAdj has self-loops and 0/1 weights, so
    # (A@order)_i >= order_i; the approx reciprocal's per-node scale error
    # cancels exactly in the cosine below (it multiplies sub linearly and the
    # rsqrt of ||sub||^2 inversely).
    denom = a_order - order + 1e-8
    inv_denom = pl.reciprocal(denom, approx=True)     # EUP slot

    sub = (fo + scd) * inv_denom                      # subgraphEmbeds (rows < D)

    # Cosine score without materializing normalized (D, TM) tensors:
    #   score = <sub, E> * rsqrt(|sub|^2) * (1 / max(||E||, 1e-12))
    # Row D of ep is zero, so s_se needs no masking; s_ss removes the pad-row
    # contribution analytically (sub[D] = a_order * inv_denom).
    s_se = jnp.sum(sub * ep, axis=0, keepdims=True)   # (1, TM)
    pad_row = a_order * inv_denom
    s_ss = jnp.sum(sub * sub, axis=0, keepdims=True) - pad_row * pad_row
    # F.normalize clamp: 1/max(||x||, 1e-12) == rsqrt(max(||x||^2, 1e-24))
    dotp = s_se * jax.lax.rsqrt(jnp.maximum(s_ss, 1e-24)) * einv_ref[...]

    # log(sigmoid(x)) = -log(1 + exp(-x)); |dotp| <= ~1 so this is stable.
    out_ref[...] = -jnp.log(1.0 + jnp.exp(-dotp)) + g_ref[...]


# ---------------------------------------------------------------------------
# Tiling / VMEM budget helpers (generation-aware)
# ---------------------------------------------------------------------------
def _round_up(x, m):
    return ((x + m - 1) // m) * m


def _vmem_capacity_bytes():
    try:
        info = pltpu.get_tpu_info()
        for name in ("vmem_capacity_bytes", "vmem_size_bytes", "vmem_bytes"):
            cap = getattr(info, name, None)
            if cap:
                return int(cap)
    except Exception:
        pass
    return 64 * 1024 * 1024   # conservative default: v7x per-TC VMEM


def _tile_vmem_bytes(tm, np_, d1):
    a_tile = 2 * np_ * tm * 1          # double-buffered int8 A^T column tile
    a_cast = np_ * tm * 2              # in-kernel bf16 upcast temporary
    resident = 2 * d1 * np_ * 2        # resident bf16 LHS ([E|1]^T / fst_aug^T)
    f32_tiles = 2 * 2 * d1 * tm * 4    # fst_aug^T f32 + [E|0]^T f32 tiles
    outs = 2 * d1 * tm * (4 + 2)       # pass-1 f32 + bf16 output tiles
    rows = 6 * 2 * tm * 4              # (1, TM) einv / gumbel / score tiles
    return a_tile + a_cast + resident + f32_tiles + outs + rows


def _plan_tiling(n, d1, budget):
    """Pick (TM, Np): Np = N padded to a 128 multiple (minimal lane padding,
    padding cost is quadratic in Np), TM = largest {1024..128} divisor of Np
    that fits the VMEM budget, preferring an even grid for v7x megacore."""
    np_ = _round_up(n, 128)
    feasible = [tm for tm in (1024, 512, 256, 128)
                if np_ % tm == 0 and _tile_vmem_bytes(tm, np_, d1) <= budget]
    if not feasible:
        # TODO(synk): huge graphs — tile the contraction dim / go sparse.
        return 128, np_
    even = [tm for tm in feasible if (np_ // tm) % 2 == 0]
    tm = even[0] if even else feasible[0]
    return tm, np_


# ---------------------------------------------------------------------------
# Wrapper
# ---------------------------------------------------------------------------
@partial(jax.jit, static_argnums=(3,))
def local_graph(adj_t_bytes, embeds, uniform_noise, seed_num):
    """adj_t_bytes: (N, N) int8/uint8 *transposed* 0/1 adjacency (A^T, i.e.
    adj_t[i, j] = A[j, i]; 1-byte so the kernel streams 1 byte/element),
    embeds: (N, D) f32, uniform_noise: (N,) in (0, 1).
    Returns (scores (N,), seeds (seed_num,))."""
    N, D = embeds.shape
    D1 = D + 1

    cap = _vmem_capacity_bytes()
    budget = int(cap * 0.70)
    TM, Np = _plan_tiling(N, D1, budget)
    pad_n = Np - N
    grid = (Np // TM,)

    # --- input prep (O(N*D) / O(N), except the pad which is O(N^2) copies) ---
    # TODO(synk): for large N the caller should supply A^T already padded to a
    #             128 multiple so this jnp.pad pass over N^2 bytes disappears.
    at8 = adj_t_bytes.astype(jnp.int8)                      # 0/1: exact
    at8 = jnp.pad(at8, ((0, pad_n), (0, pad_n)))

    eT = embeds.astype(jnp.float32).T                       # (D, N)
    eT_aug = jnp.concatenate([eT, jnp.ones((1, N), jnp.float32)], axis=0)
    eT_pad = jnp.concatenate([eT, jnp.zeros((1, N), jnp.float32)], axis=0)
    eT_aug16 = jnp.pad(eT_aug, ((0, 0), (0, pad_n))).astype(jnp.bfloat16)
    eT_pad32 = jnp.pad(eT_pad, ((0, 0), (0, pad_n)))

    e_inv = 1.0 / jnp.maximum(
        jnp.sqrt(jnp.sum(embeds.astype(jnp.float32) ** 2, axis=-1)), 1e-12)
    e_inv_row = jnp.pad(e_inv, (0, pad_n)).reshape(1, Np)
    gumbel = -jnp.log(-jnp.log(uniform_noise))              # (N,)
    g_row = jnp.pad(gumbel, (0, pad_n)).reshape(1, Np)

    tile_bytes = _tile_vmem_bytes(TM, Np, D1)
    cparams = pltpu.CompilerParams(
        dimension_semantics=("parallel",),
        vmem_limit_bytes=int(min(tile_bytes + (8 << 20), int(cap * 0.90))),
    )

    # ---- pass 1: fst_aug^T = [A@E - E | order]^T  (f32 + bf16 outputs) ----
    fo32, fo16 = pl.pallas_call(
        _pass1_kernel,
        out_shape=(jax.ShapeDtypeStruct((D1, Np), jnp.float32),
                   jax.ShapeDtypeStruct((D1, Np), jnp.bfloat16)),
        grid=grid,
        in_specs=[
            pl.BlockSpec((Np, TM), lambda i: (0, i)),   # A^T column tile (int8)
            pl.BlockSpec((D1, Np), lambda i: (0, 0)),   # resident [E | 1]^T bf16
            pl.BlockSpec((D1, TM), lambda i: (0, i)),   # [E | 0]^T f32 tile
        ],
        out_specs=(pl.BlockSpec((D1, TM), lambda i: (0, i)),
                   pl.BlockSpec((D1, TM), lambda i: (0, i))),
        compiler_params=cparams,
    )(at8, eT_aug16, eT_pad32)

    # ---- pass 2: second SpMM + scoring epilogue (lane-dense (1, TM) out) ---
    # NOTE: fst_aug is fed to the MXU in bf16; degrees > 256 / fst round to
    # ~8 mantissa bits (~0.4% rel err in scd), acceptable for this scoring.
    scores_row = pl.pallas_call(
        _pass2_kernel,
        out_shape=jax.ShapeDtypeStruct((1, Np), jnp.float32),
        grid=grid,
        in_specs=[
            pl.BlockSpec((Np, TM), lambda i: (0, i)),   # A^T column tile (int8)
            pl.BlockSpec((D1, Np), lambda i: (0, 0)),   # resident fst_aug^T bf16
            pl.BlockSpec((D1, TM), lambda i: (0, i)),   # fst_aug^T f32 tile
            pl.BlockSpec((D1, TM), lambda i: (0, i)),   # [E | 0]^T f32 tile
            pl.BlockSpec((1, TM), lambda i: (0, i)),    # 1/max(||E||, 1e-12)
            pl.BlockSpec((1, TM), lambda i: (0, i)),    # gumbel noise
        ],
        out_specs=pl.BlockSpec((1, TM), lambda i: (0, i)),
        compiler_params=cparams,
    )(at8, fo16, fo32, eT_pad32, e_inv_row, g_row)

    scores = scores_row[0, :N]
    _, seeds = jax.lax.top_k(scores, seed_num)
    return scores, seeds


# ---------------------------------------------------------------------------
# Pure-JAX reference (mirrors the PyTorch module, same noise)
# ---------------------------------------------------------------------------
def _reference(adj, embeds, uniform_noise):
    order = jnp.sum(adj, axis=-1, keepdims=True)
    fst = adj @ embeds - embeds
    scd = adj @ fst - fst - order * embeds
    scd_num = adj @ order - order - order
    sub = (fst + scd) / (order + scd_num + 1e-8)
    sub_n = sub / jnp.maximum(
        jnp.sqrt(jnp.sum(sub * sub, axis=-1, keepdims=True)), 1e-12)
    e_n = embeds / jnp.maximum(
        jnp.sqrt(jnp.sum(embeds * embeds, axis=-1, keepdims=True)), 1e-12)
    raw = jax.nn.sigmoid(jnp.sum(sub_n * e_n, axis=-1))
    g = -jnp.log(-jnp.log(uniform_noise))
    return jnp.log(raw) + g


if __name__ == "__main__":
    N, D, SEED_NUM = 64, 32, 8

    key = jax.random.PRNGKey(0)
    k_adj, k_emb, k_noise = jax.random.split(key, 3)

    # Dense "allOneAdj": random 0/1 edges plus self-loops (all edge weights 1).
    adj = jax.random.bernoulli(k_adj, p=0.3, shape=(N, N)).astype(jnp.float32)
    adj = jnp.maximum(adj, jnp.eye(N, dtype=jnp.float32))
    # 1-byte, pre-transposed adjacency is built once at construction time, so
    # the kernel wrapper never runs a standalone N^2 cast/transpose pass.
    adj_t8 = adj.T.astype(jnp.int8)

    embeds = jax.random.normal(k_emb, (N, D), dtype=jnp.float32)

    # Uniform noise in (0, 1) for the Gumbel perturbation (torch.rand analogue).
    noise = jax.random.uniform(
        k_noise, (N,), dtype=jnp.float32, minval=1e-6, maxval=1.0 - 1e-6)

    scores, seeds = local_graph(adj_t8, embeds, noise, SEED_NUM)
    jax.block_until_ready((scores, seeds))

    ref = _reference(adj, embeds, noise)
    err = float(jnp.max(jnp.abs(scores - ref)))
    assert err < 1e-1, f"kernel/reference mismatch: max abs err = {err}"
    print("KERNEL_OK")
</pallas_src>

<mosaic_0001>
module attributes {stable_mosaic.version = 11 : i64} {
  func.func @_pass1_kernel(%arg0: i32, %arg1: memref<128x128xi8, #tpu.memory_space<vmem>>, %arg2: memref<33x128xbf16, #tpu.memory_space<vmem>>, %arg3: memref<33x128xf32, #tpu.memory_space<vmem>>, %arg4: memref<33x128xf32, #tpu.memory_space<vmem>>, %arg5: memref<33x128xbf16, #tpu.memory_space<vmem>>) attributes {dimension_semantics = [#tpu.dimension_semantics<parallel>], iteration_bounds = array<i64: 1>, scalar_prefetch = 0 : i64, scratch_operands = 0 : i64, tpu.core_type = #tpu.core_type<tc>, window_params = [{transform_indices = @transform_0, window_bounds = array<i64: 128, 128>}, {pipeline_mode = #tpu.pipeline_mode<synchronous>, transform_indices = @transform_1, window_bounds = array<i64: 33, 128>}, {transform_indices = @transform_2, window_bounds = array<i64: 33, 128>}, {transform_indices = @transform_3, window_bounds = array<i64: 33, 128>}, {transform_indices = @transform_4, window_bounds = array<i64: 33, 128>}]} {
    %c0 = arith.constant 0 : index
    %c0_0 = arith.constant 0 : index
    %0 = vector.load %arg1[%c0, %c0_0] : memref<128x128xi8, #tpu.memory_space<vmem>>, vector<128x128xi8>
    %1 = arith.sitofp %0 : vector<128x128xi8> to vector<128x128xbf16>
    %c0_1 = arith.constant 0 : index
    %c0_2 = arith.constant 0 : index
    %2 = vector.load %arg2[%c0_1, %c0_2] : memref<33x128xbf16, #tpu.memory_space<vmem>>, vector<33x128xbf16>
    %cst = arith.constant dense<0.000000e+00> : vector<33x128xf32>
    %3 = tpu.matmul %2, %1, %cst {dimension_numbers = #tpu.dot_dimension_numbers<[1], [0], [0], [1], [0, 0, 1, 1], [], []>} : vector<33x128xbf16>, vector<128x128xbf16>, vector<33x128xf32> -> vector<33x128xf32>
    %c0_3 = arith.constant 0 : index
    %c0_4 = arith.constant 0 : index
    %4 = vector.load %arg3[%c0_3, %c0_4] : memref<33x128xf32, #tpu.memory_space<vmem>>, vector<33x128xf32>
    %5 = arith.subf %3, %4 : vector<33x128xf32>
    %c0_5 = arith.constant 0 : index
    %c0_6 = arith.constant 0 : index
    %6 = vector.load %arg4[%c0_5, %c0_6] : memref<33x128xf32, #tpu.memory_space<vmem>>, vector<33x128xf32>
    tpu.vector_store %arg4[%c0_5, %c0_6], %5 {strides = array<i32>} : memref<33x128xf32, #tpu.memory_space<vmem>>, vector<33x128xf32>,
    %7 = arith.truncf %5 : vector<33x128xf32> to vector<33x128xbf16>
    %c0_7 = arith.constant 0 : index
    %c0_8 = arith.constant 0 : index
    %8 = vector.load %arg5[%c0_7, %c0_8] : memref<33x128xbf16, #tpu.memory_space<vmem>>, vector<33x128xbf16>
    tpu.vector_store %arg5[%c0_7, %c0_8], %7 {strides = array<i32>} : memref<33x128xbf16, #tpu.memory_space<vmem>>, vector<33x128xbf16>,
    return
  }
  func.func @transform_0(%arg0: i32) -> (i32, i32) {
    %c0_i32 = arith.constant 0 : i32
    %c0_i32_0 = arith.constant 0 : i32
    return %c0_i32, %arg0 : i32, i32
  }
  func.func @transform_1(%arg0: i32) -> (i32, i32) {
    %c0_i32 = arith.constant 0 : i32
    %c0_i32_0 = arith.constant 0 : i32
    %c0_i32_1 = arith.constant 0 : i32
    return %c0_i32, %c0_i32_0 : i32, i32
  }
  func.func @transform_2(%arg0: i32) -> (i32, i32) {
    %c0_i32 = arith.constant 0 : i32
    %c0_i32_0 = arith.constant 0 : i32
    return %c0_i32, %arg0 : i32, i32
  }
  func.func @transform_3(%arg0: i32) -> (i32, i32) {
    %c0_i32 = arith.constant 0 : i32
    %c0_i32_0 = arith.constant 0 : i32
    return %c0_i32, %arg0 : i32, i32
  }
  func.func @transform_4(%arg0: i32) -> (i32, i32) {
    %c0_i32 = arith.constant 0 : i32
    %c0_i32_0 = arith.constant 0 : i32
    return %c0_i32, %arg0 : i32, i32
  }
}

module attributes {stable_mosaic.version = 11 : i64} {
  func.func @_pass2_kernel(%arg0: i32, %arg1: memref<128x128xi8, #tpu.memory_space<vmem>>, %arg2: memref<33x128xbf16, #tpu.memory_space<vmem>>, %arg3: memref<33x128xf32, #tpu.memory_space<vmem>>, %arg4: memref<33x128xf32, #tpu.memory_space<vmem>>, %arg5: memref<1x128xf32, #tpu.memory_space<vmem>>, %arg6: memref<1x128xf32, #tpu.memory_space<vmem>>, %arg7: memref<1x128xf32, #tpu.memory_space<vmem>>) attributes {dimension_semantics = [#tpu.dimension_semantics<parallel>], iteration_bounds = array<i64: 1>, scalar_prefetch = 0 : i64, scratch_operands = 0 : i64, tpu.core_type = #tpu.core_type<tc>, window_params = [{transform_indices = @transform_0, window_bounds = array<i64: 128, 128>}, {pipeline_mode = #tpu.pipeline_mode<synchronous>, transform_indices = @transform_1, window_bounds = array<i64: 33, 128>}, {transform_indices = @transform_2, window_bounds = array<i64: 33, 128>}, {transform_indices = @transform_3, window_bounds = array<i64: 33, 128>}, {transform_indices = @transform_4, window_bounds = array<i64: 1, 128>}, {transform_indices = @transform_5, window_bounds = array<i64: 1, 128>}, {transform_indices = @transform_6, window_bounds = array<i64: 1, 128>}]} {
    %c0 = arith.constant 0 : index
    %c0_0 = arith.constant 0 : index
    %0 = vector.load %arg1[%c0, %c0_0] : memref<128x128xi8, #tpu.memory_space<vmem>>, vector<128x128xi8>
    %1 = arith.sitofp %0 : vector<128x128xi8> to vector<128x128xbf16>
    %c0_1 = arith.constant 0 : index
    %c0_2 = arith.constant 0 : index
    %2 = vector.load %arg2[%c0_1, %c0_2] : memref<33x128xbf16, #tpu.memory_space<vmem>>, vector<33x128xbf16>
    %cst = arith.constant dense<0.000000e+00> : vector<33x128xf32>
    %3 = tpu.matmul %2, %1, %cst {dimension_numbers = #tpu.dot_dimension_numbers<[1], [0], [0], [1], [0, 0, 1, 1], [], []>} : vector<33x128xbf16>, vector<128x128xbf16>, vector<33x128xf32> -> vector<33x128xf32>
    %c0_3 = arith.constant 0 : index
    %c0_4 = arith.constant 0 : index
    %4 = vector.load %arg3[%c0_3, %c0_4] : memref<33x128xf32, #tpu.memory_space<vmem>>, vector<33x128xf32>
    %c0_5 = arith.constant 0 : index
    %c0_6 = arith.constant 0 : index
    %5 = vector.load %arg4[%c0_5, %c0_6] : memref<33x128xf32, #tpu.memory_space<vmem>>, vector<33x128xf32>
    %6 = vector.extract_strided_slice %4 {offsets = [32, 0], sizes = [1, 128], strides = [1, 1]} : vector<33x128xf32> to vector<1x128xf32>
    %7 = vector.extract_strided_slice %3 {offsets = [32, 0], sizes = [1, 128], strides = [1, 1]} : vector<33x128xf32> to vector<1x128xf32>
    %8 = arith.subf %3, %4 : vector<33x128xf32>
    %9 = vector.broadcast %6 : vector<1x128xf32> to vector<33x128xf32>
    %10 = arith.mulf %9, %5 : vector<33x128xf32>
    %11 = arith.subf %8, %10 : vector<33x128xf32>
    %12 = arith.subf %7, %6 : vector<1x128xf32>
    %cst_7 = arith.constant 9.99999993E-9 : f32
    %13 = vector.broadcast %cst_7 : f32 to vector<1x128xf32>
    %14 = arith.addf %12, %13 : vector<1x128xf32>
    %15 = tpu.reciprocal %14 {approx = true} : vector<1x128xf32> -> vector<1x128xf32>
    %16 = arith.addf %4, %11 : vector<33x128xf32>
    %17 = vector.broadcast %15 : vector<1x128xf32> to vector<33x128xf32>
    %18 = arith.mulf %16, %17 : vector<33x128xf32>
    %19 = arith.mulf %18, %5 : vector<33x128xf32>
    %cst_8 = arith.constant dense<0.000000e+00> : vector<128xf32>
    %20 = vector.multi_reduction <add>, %19, %cst_8 [0] : vector<33x128xf32> to vector<128xf32>
    %21 = vector.shape_cast %20 : vector<128xf32> to vector<1x128xf32>
    %22 = arith.mulf %7, %15 : vector<1x128xf32>
    %23 = arith.mulf %18, %18 : vector<33x128xf32>
    %cst_9 = arith.constant dense<0.000000e+00> : vector<128xf32>
    %24 = vector.multi_reduction <add>, %23, %cst_9 [0] : vector<33x128xf32> to vector<128xf32>
    %25 = vector.shape_cast %24 : vector<128xf32> to vector<1x128xf32>
    %26 = arith.mulf %22, %22 : vector<1x128xf32>
    %27 = arith.subf %25, %26 : vector<1x128xf32>
    %cst_10 = arith.constant 1.000000e-24 : f32
    %28 = vector.broadcast %cst_10 : f32 to vector<1x128xf32>
    %29 = arith.maximumf %27, %28 : vector<1x128xf32>
    %30 = math.rsqrt %29 : vector<1x128xf32>
    %31 = arith.mulf %21, %30 : vector<1x128xf32>
    %c0_11 = arith.constant 0 : index
    %c0_12 = arith.constant 0 : index
    %32 = vector.load %arg5[%c0_11, %c0_12] : memref<1x128xf32, #tpu.memory_space<vmem>>, vector<1x128xf32>
    %33 = arith.mulf %31, %32 : vector<1x128xf32>
    %cst_13 = arith.constant 0.000000e+00 : f32
    %34 = vector.broadcast %cst_13 : f32 to vector<1x128xf32>
    %35 = arith.subf %34, %33 : vector<1x128xf32>
    %36 = math.exp %35 : vector<1x128xf32>
    %cst_14 = arith.constant 1.000000e+00 : f32
    %37 = vector.broadcast %cst_14 : f32 to vector<1x128xf32>
    %38 = arith.addf %37, %36 : vector<1x128xf32>
    %39 = math.log %38 : vector<1x128xf32>
    %cst_15 = arith.constant 0.000000e+00 : f32
    %40 = vector.broadcast %cst_15 : f32 to vector<1x128xf32>
    %41 = arith.subf %40, %39 : vector<1x128xf32>
    %c0_16 = arith.constant 0 : index
    %c0_17 = arith.constant 0 : index
    %42 = vector.load %arg6[%c0_16, %c0_17] : memref<1x128xf32, #tpu.memory_space<vmem>>, vector<1x128xf32>
    %43 = arith.addf %41, %42 : vector<1x128xf32>
    %c0_18 = arith.constant 0 : index
    %c0_19 = arith.constant 0 : index
    %44 = vector.load %arg7[%c0_18, %c0_19] : memref<1x128xf32, #tpu.memory_space<vmem>>, vector<1x128xf32>
    tpu.vector_store %arg7[%c0_18, %c0_19], %43 {strides = array<i32>} : memref<1x128xf32, #tpu.memory_space<vmem>>, vector<1x128xf32>,
    return
  }
  func.func @transform_0(%arg0: i32) -> (i32, i32) {
    %c0_i32 = arith.constant 0 : i32
    %c0_i32_0 = arith.constant 0 : i32
    return %c0_i32, %arg0 : i32, i32
  }
  func.func @transform_1(%arg0: i32) -> (i32, i32) {
    %c0_i32 = arith.constant 0 : i32
    %c0_i32_0 = arith.constant 0 : i32
    %c0_i32_1 = arith.constant 0 : i32
    return %c0_i32, %c0_i32_0 : i32, i32
  }
  func.func @transform_2(%arg0: i32) -> (i32, i32) {
    %c0_i32 = arith.constant 0 : i32
    %c0_i32_0 = arith.constant 0 : i32
    return %c0_i32, %arg0 : i32, i32
  }
  func.func @transform_3(%arg0: i32) -> (i32, i32) {
    %c0_i32 = arith.constant 0 : i32
    %c0_i32_0 = arith.constant 0 : i32
    return %c0_i32, %arg0 : i32, i32
  }
  func.func @transform_4(%arg0: i32) -> (i32, i32) {
    %c0_i32 = arith.constant 0 : i32
    %c0_i32_0 = arith.constant 0 : i32
    return %c0_i32, %arg0 : i32, i32
  }
  func.func @transform_5(%arg0: i32) -> (i32, i32) {
    %c0_i32 = arith.constant 0 : i32
    %c0_i32_0 = arith.constant 0 : i32
    return %c0_i32, %arg0 : i32, i32
  }
  func.func @transform_6(%arg0: i32) -> (i32, i32) {
    %c0_i32 = arith.constant 0 : i32
    %c0_i32_0 = arith.constant 0 : i32
    return %c0_i32, %arg0 : i32, i32
  }
}

</mosaic_0001>

<bundles_post_ra>
// kernel: local_graph.3
= control target key start
LH: loop header
LB: loop body
LE: loop exit
PB: predicated region body
PF: predicated region fallthrough
CT: control target
= control target key end

     0   :  { %vm158_vm0 = vcmask 1040384   ;;  %s353_s0 = inlined_call_operand.vmem [shape: s8[128,128], index: 0, kind: input, shape index: {}]   ;;  %s354_s1 = inlined_call_operand.vmem [shape: bf16[33,128], index: 1, kind: input, shape index: {}]   ;;  %s355_s2 = inlined_call_operand.vmem [shape: f32[33,128], index: 2, kind: input, shape index: {}]   ;;  %s356_s3 = inlined_call_operand.vmem [shape: f32[33,128], index: 3, kind: input, shape index: {}]   ;;  %s357_s4 = inlined_call_operand.vmem [shape: f32[1,128], index: 4, kind: input, shape index: {}]   ;;  %s358_s5 = inlined_call_operand.vmem [shape: f32[1,128], index: 5, kind: input, shape index: {}]   ;;  %s359_s6 = inlined_call_operand.vmem [shape: f32[1,128], index: 6, kind: output, shape index: {}]  }
   0x1   :  { %v26_v0 = vld [vmem:[%s353_s0 + $0x18] sm:$0xff]  ;;  %v25_v1 = vld [vmem:[%s353_s0 + $0x10] sm:$0xff]  ;;  %v24_v18 = vld [vmem:[%s353_s0 + $0x8] sm:$0xff] }
   0x2   :  { %v41_v2 = vunpack.c.2.s8 %v26_v0  ;;  %v42_v3 = vunpack.c.3.s8 %v26_v0  ;;  %v39_v4 = vunpack.c.0.s8 %v26_v0  ;;  %v40_v5 = vunpack.c.1.s8 %v26_v0  ;;  %v23_v29 = vld [vmem:[%s353_s0] sm:$0xff]  ;;  %v71_v43 = vld [vmem:[%s354_s1 + $0x10] sm:$0x1]  ;;  %v223_v48 = vld [vmem:[%s354_s1 + $0x8] sm:$0xff] }
   0x3   :  { %v37_v6 = vunpack.c.2.s8 %v25_v1  ;;  %v38_v7 = vunpack.c.3.s8 %v25_v1  ;;  %v35_v13 = vunpack.c.0.s8 %v25_v1  ;;  %v36_v14 = vunpack.c.1.s8 %v25_v1  ;;  %v222_v46 = vld [vmem:[%s354_s1] sm:$0xff]  ;;  %v112_v57 = vld [vmem:[%s355_s2 + $0x8] sm:$0xff]  ;;  %v113_v59 = vld [vmem:[%s355_s2 + $0x10] sm:$0xff] }
   0x4   :  { %v57_v8 = vcvt.s32.f32 %v41_v2  ;;  %v58_v9 = vcvt.s32.f32 %v42_v3  ;;  %v55_v10 = vcvt.s32.f32 %v39_v4  ;;  %v56_v11 = vcvt.s32.f32 %v40_v5  ;;  %v115_v51 = vld [vmem:[%s355_s2 + $0x20] sm:$0x1]  ;;  %v117_v58 = vld [vmem:[%s356_s3 + $0x8] sm:$0xff]  ;;  %v118_v60 = vld [vmem:[%s356_s3 + $0x10] sm:$0xff] }
   0x5   :  { %v53_v16 = vcvt.s32.f32 %v37_v6  ;;  %v54_v17 = vcvt.s32.f32 %v38_v7  ;;  %v51_v19 = vcvt.s32.f32 %v35_v13  ;;  %v52_v20 = vcvt.s32.f32 %v36_v14  ;;  %v111_v52 = vld [vmem:[%s355_s2] sm:$0xff]  ;;  %v114_v5 = vld [vmem:[%s355_s2 + $0x18] sm:$0xff] }
   0x6   :  { %v66_v12 = vpack.c.bf16 %v58_v9, %v57_v8  ;;  %v65_v15 = vpack.c.bf16 %v56_v11, %v55_v10  ;;  %v33_v22 = vunpack.c.2.s8 %v24_v18  ;;  %v34_v23 = vunpack.c.3.s8 %v24_v18  ;;  %v240_v53 = vld [vmem:[%s355_s2 + $0x20] ss:$0 sm:$0xff]  ;;  %v119_v6 = vld [vmem:[%s356_s3 + $0x18] sm:$0xff] }
   0x7   :  { %v64_v21 = vpack.c.bf16 %v54_v17, %v53_v16  ;;  %v63_v24 = vpack.c.bf16 %v52_v20, %v51_v19  ;;  %v31_v27 = vunpack.c.0.s8 %v24_v18  ;;  %v32_v28 = vunpack.c.1.s8 %v24_v18  ;;  %v116_v55 = vld [vmem:[%s356_s3] sm:$0xff] }
   0x8   :  { %88 = vmatpush.bf16.msra.mxu0 %v66_v12  ;;  %225 = vmatpush.bf16.msra.mxu2 %v66_v12  ;;  %v49_v25 = vcvt.s32.f32 %v33_v22  ;;  %v50_v26 = vcvt.s32.f32 %v34_v23  ;;  %v29_v30 = vunpack.c.2.s8 %v23_v29  ;;  %v30_v34 = vunpack.c.3.s8 %v23_v29  ;;  %v120_v62 = vld [vmem:[%s356_s3 + $0x20] sm:$0x1] }
   0x9   :  { %224 = vmatpush.bf16.msra.mxu1 %v66_v12  ;;  %v47_v32 = vcvt.s32.f32 %v31_v27  ;;  %v48_v33 = vcvt.s32.f32 %v32_v28  ;;  %v27_v35 = vunpack.c.0.s8 %v23_v29  ;;  %v28_v39 = vunpack.c.1.s8 %v23_v29 }
   0xa   :  { %v62_v31 = vpack.c.bf16 %v50_v26, %v49_v25  ;;  %v45_v37 = vcvt.s32.f32 %v29_v30  ;;  %v46_v38 = vcvt.s32.f32 %v30_v34  ;;  %v81_v44 = vunpack.c.l.b16 %v71_v43 }
   0xb   :  { %v61_v36 = vpack.c.bf16 %v48_v33, %v47_v32  ;;  %v43_v41 = vcvt.s32.f32 %v27_v35  ;;  %v44_v42 = vcvt.s32.f32 %v28_v39  ;;  %v127_v1 = vmul.f32 %v240_v53, %v116_v55 }
   0xc   :  { %89 = vmatpush.bf16.msra.mxu0 %v65_v15  ;;  %227 = vmatpush.bf16.msra.mxu2 %v65_v15  ;;  %v60_v40 = vpack.c.bf16 %v46_v38, %v45_v37  ;;  %v84_v47 = vpack.c.b16 %v81_v44, %v81_v44  ;;  %v128_v3 = vmul.f32 %v240_v53, %v117_v58 }
   0xd   :  { %226 = vmatpush.bf16.msra.mxu1 %v65_v15  ;;  %v59_v45 = vpack.c.bf16 %v44_v42, %v43_v41  ;;  %v129_v8 = vmul.f32 %v240_v53, %v118_v60  ;;  %v131_v9 = vmul.f32 %v240_v53, %v120_v62  ;;  %v130_v11 = vmul.f32 %v240_v53, %v119_v6 }
  0x10   :  { %90 = vmatpush.bf16.msra.mxu0 %v64_v21  ;;  %229 = vmatpush.bf16.msra.mxu2 %v64_v21 }
  0x11   :  { %228 = vmatpush.bf16.msra.mxu1 %v64_v21 }
  0x14   :  { %91 = vmatpush.bf16.msra.mxu0 %v63_v24  ;;  %231 = vmatpush.bf16.msra.mxu2 %v63_v24 }
  0x15   :  { %230 = vmatpush.bf16.msra.mxu1 %v63_v24 }
  0x18   :  { %92 = vmatpush.bf16.msra.mxu0 %v62_v31  ;;  %233 = vmatpush.bf16.msra.mxu2 %v62_v31 }
  0x19   :  { %232 = vmatpush.bf16.msra.mxu1 %v62_v31 }
  0x1c   :  { %93 = vmatpush.bf16.msra.mxu0 %v61_v36  ;;  %235 = vmatpush.bf16.msra.mxu2 %v61_v36 }
  0x1d   :  { %234 = vmatpush.bf16.msra.mxu1 %v61_v36 }
  0x20   :  { %94 = vmatpush.bf16.msra.mxu0 %v60_v40  ;;  %237 = vmatpush.bf16.msra.mxu2 %v60_v40 }
  0x21   :  { %236 = vmatpush.bf16.msra.mxu1 %v60_v40 }
  0x24   :  { %95 = vmatpush.bf16.msra.mxu0 %v59_v45  ;;  %239 = vmatpush.bf16.msra.mxu2 %v59_v45 }
  0x25   :  { %238 = vmatpush.bf16.msra.mxu1 %v59_v45 }
  0x27   :  { %96 = vmatmul.bf16.vlgmr.msra.gmra.mxu0 %v222_v46  ;;  %106 = vmatmul.bf16.vlgmr.msra.gmra.mxu2 %v84_v47 }
  0x28   :  { %101 = vmatmul.bf16.vlgmr.msra.gmra.mxu1 %v223_v48 }
  0xa4   :  { %v97_v49 = vpop.f32.mrf.mxu0 }
  0xa5   :  { %v102_v50 = vpop.f32.mrf.mxu1  ;;  %v121_v0 = vsub.f32 %v97_v49, %v111_v52 }
  0xa6   :  { %v123_v7 = vsub.f32 %v102_v50, %v113_v59 }
  0xa7   :  { %v132_v12 = vsub.f32 %v121_v0, %v127_v1 }
  0xa8   :  { %v134_v15 = vsub.f32 %v123_v7, %v129_v8 }
  0xa9   :  { %v139_v19 = vadd.f32 %v132_v12, %v111_v52 }
  0xaa   :  { %v314_v54 = vpop.f32.mrf.mxu2  ;;  %v141_v22 = vadd.f32 %v134_v15, %v113_v59 }
  0xab   :  { %v125_v56 = vsub.f32 %v314_v54, %v115_v51 }
  0xac   :  { %v99_v61 = vpop.f32.mrf.mxu0 }
  0xad   :  { %v137_v63 = vadd.f32 1e-08, %v125_v56  ;;  %v122_v2 = vsub.f32 %v99_v61, %v112_v57  ;;  %v104_v4 = vpop.f32.mrf.mxu1  ;;  %v136_v16 = vsub.f32 %v125_v56, %v131_v9  ;;  %v198_v9 = vld [vmem:[%s357_s4] sm:$0x1] }
  0xae   :  { %v124_v10 = vsub.f32 %v104_v4, %v114_v5 }
  0xaf   :  { %241 = vrcp.f32 %v137_v63  ;;  %v133_v13 = vsub.f32 %v122_v2, %v128_v3  ;;  %v143_v23 = vadd.f32 %v136_v16, %v115_v51 }
  0xb0   :  { %v135_v18 = vsub.f32 %v124_v10, %v130_v11 }
  0xb1   :  { %v140_v21 = vadd.f32 %v133_v13, %v112_v57 }
  0xb2   :  { %v109_v14 = vpop.f32.mrf.mxu2  ;;  %v142_v26 = vadd.f32 %v135_v18, %v114_v5  ;;  %v207_v18 = vld [vmem:[%s358_s5] sm:$0x1] }
  0xb5   :  { %v242_v17 = vpop.eup %241 }
  0xb6   :  { %v144_v20 = vperm.slane %v242_v17, 0  ;;  %v167_v51 = vmul.f32 %v242_v17, %v314_v54 }
  0xb8   :  { %v145_v24 = vmul.f32 %v144_v20, %v139_v19  ;;  %v146_v25 = vmul.f32 %v144_v20, %v140_v21  ;;  %v147_v27 = vmul.f32 %v144_v20, %v141_v22  ;;  %v149_v28 = vmul.f32 %v144_v20, %v143_v23 }
  0xb9   :  { %v148_v31 = vmul.f32 %v144_v20, %v142_v26  ;;  %v184_v57 = vmul.f32 %v167_v51, %v167_v51 }
  0xba   :  { %v168_v29 = vmul.f32 %v145_v24, %v145_v24  ;;  %v169_v30 = vmul.f32 %v146_v25, %v146_v25  ;;  %v150_v32 = vmul.f32 %v145_v24, %v116_v55  ;;  %v151_v33 = vmul.f32 %v146_v25, %v117_v58 }
  0xbb   :  { %v170_v35 = vmul.f32 %v147_v27, %v147_v27  ;;  %v172_v36 = vmul.f32 %v149_v28, %v149_v28  ;;  %v171_v37 = vmul.f32 %v148_v31, %v148_v31  ;;  %v152_v42 = vmul.f32 %v147_v27, %v118_v60 }
  0xbc   :  { %v173_v34 = vadd.f32 %v169_v30, %v168_v29  ;;  %v155_v39 = vadd.f32 %v151_v33, %v150_v32  ;;  %v153_v46 = vmul.f32 %v148_v31, %v119_v6  ;;  %v154_v48 = vmul.f32 %v149_v28, %v120_v62 }
  0xbd   :  { %v176_v41 = vsel %vm158_vm0, %v172_v36, 0.0 }
  0xbe   :  { %v174_v38 = vadd.f32 %v173_v34, %v170_v35  ;;  %v156_v44 = vadd.f32 %v155_v39, %v152_v42  ;;  %v159_v53 = vsel %vm158_vm0, %v154_v48, 0.0 }
  0xc0   :  { %v175_v40 = vadd.f32 %v174_v38, %v171_v37  ;;  %v157_v49 = vadd.f32 %v156_v44, %v153_v46 }
  0xc2   :  { %v177_v43 = vadd.f32 %v176_v41, %v175_v40  ;;  %v160_v55 = vadd.f32 %v159_v53, %v157_v49 }
  0xc4   :  { %v178_v45 = vrot.slane %v177_v43, 4  ;;  %v161_v59 = vrot.slane %v160_v55, 4 }
  0xc6   :  { %v179_v47 = vadd.f32 %v178_v45, %v177_v43  ;;  %v162_v63 = vadd.f32 %v161_v59, %v160_v55 }
  0xc8   :  { %v180_v50 = vrot.slane %v179_v47, 2  ;;  %v163_v0 = vrot.slane %v162_v63, 2 }
  0xca   :  { %v181_v52 = vadd.f32 %v180_v50, %v179_v47  ;;  %v164_v62 = vadd.f32 %v163_v0, %v162_v63 }
  0xcc   :  { %v182_v56 = vrot.slane %v181_v52, 1  ;;  %v165_v5 = vrot.slane %v164_v62, 1 }
  0xce   :  { %v183_v58 = vadd.f32 %v182_v56, %v181_v52  ;;  %v166_v7 = vadd.f32 %v165_v5, %v164_v62 }
  0xd0   :  { %v185_v61 = vsub.f32 %v183_v58, %v184_v57 }
  0xd2   :  { %v186_v60 = vmax.f32 %v185_v61, 1e-24 }
  0xd4   :  { %243 = vrsqrt.f32 %v186_v60  ;;  %vm193_vm2 = vweird.f32 %v186_v60 }
  0xda   :  { %v244_v1 = vpop.eup %243 }
  0xdb   :  { %v188_v2 = vmul.f32 %v244_v1, %v186_v60  ;;  %vm194_vm1 = vweird.f32 %v244_v1 }
  0xdc   :  { %vm195_vm3 = vmor %vm193_vm2, %vm194_vm1 }
  0xdd   :  { %v189_v3 = vmul.f32 %v244_v1, %v188_v2 }
  0xdf   :  { %v190_v4 = vmul.f32 0.5, %v189_v3 }
  0xe1   :  { %v191_v54 = vsub.f32 1.5, %v190_v4 }
  0xe3   :  { %v192_v6 = vmul.f32 %v244_v1, %v191_v54 }
  0xe5   :  { %v196_v8 = vsel %vm195_vm3, %v244_v1, %v192_v6 }
  0xe6   :  { %v197_v10 = vmul.f32 %v196_v8, %v166_v7 }
  0xe8   :  { %v199_v11 = vmul.f32 %v198_v9, %v197_v10 }
  0xea   :  { %v200_v12 = vsub.f32 0.0, %v199_v11 }
  0xec   :  { %v201_v13 = vmul.f32 1.442695, %v200_v12 }
  0xee   :  { %245 = vpow2.f32 %v201_v13 }
  0xf4   :  { %v246_v14 = vpop.eup %245 }
  0xf5   :  { %v203_v15 = vadd.f32 1.0, %v246_v14 }
  0xf7   :  { %247 = vlog2.f32 %v203_v15 }
  0xfd   :  { %v248_v16 = vpop.eup %247 }
  0xfe   :  { %v205_v17 = vmul.f32 0.6931472, %v248_v16 }
 0x100   :  { %v206_v19 = vsub.f32 0.0, %v205_v17 }
 0x102   :  { %v208_v20 = vadd.f32 %v207_v18, %v206_v19 }
 0x104   :  { %209 = vst [vmem:[%s359_s6] sm:$0x1] %v208_v20 }

// kernel: local_graph.2
= control target key start
LH: loop header
LB: loop body
LE: loop exit
PB: predicated region body
PF: predicated region fallthrough
CT: control target
= control target key end

     0   :  { %vm128_vm0 = vcmask 1040384   ;;  %vm129_vm1 = vsmask.f32 256  ;;  %s267_s0 = inlined_call_operand.vmem [shape: s8[128,128], index: 0, kind: input, shape index: {}]   ;;  %s268_s1 = inlined_call_operand.vmem [shape: bf16[33,128], index: 1, kind: input, shape index: {}]   ;;  %s269_s2 = inlined_call_operand.vmem [shape: f32[33,128], index: 2, kind: input, shape index: {}]   ;;  %s270_s3 = inlined_call_operand.vmem [shape: f32[33,128], index: 3, kind: output, shape index: {0}]   ;;  %s271_s4 = inlined_call_operand.vmem [shape: bf16[33,128], index: 4, kind: output, shape index: {1}]  }
   0x1   :  { %v19_v0 = vld [vmem:[%s267_s0 + $0x18] sm:$0xff]  ;;  %v18_v1 = vld [vmem:[%s267_s0 + $0x10] sm:$0xff]  ;;  %v17_v18 = vld [vmem:[%s267_s0 + $0x8] sm:$0xff] }
   0x2   :  { %v34_v2 = vunpack.c.2.s8 %v19_v0  ;;  %v35_v3 = vunpack.c.3.s8 %v19_v0  ;;  %v32_v4 = vunpack.c.0.s8 %v19_v0  ;;  %v33_v5 = vunpack.c.1.s8 %v19_v0  ;;  %v16_v29 = vld [vmem:[%s267_s0] sm:$0xff]  ;;  %v64_v43 = vld [vmem:[%s268_s1 + $0x10] sm:$0x1]  ;;  %v151_v47 = vld [vmem:[%s268_s1 + $0x8] sm:$0xff] }
   0x3   :  { %v30_v6 = vunpack.c.2.s8 %v18_v1  ;;  %v31_v7 = vunpack.c.3.s8 %v18_v1  ;;  %v28_v13 = vunpack.c.0.s8 %v18_v1  ;;  %v29_v14 = vunpack.c.1.s8 %v18_v1  ;;  %v150_v46 = vld [vmem:[%s268_s1] sm:$0xff]  ;;  %v106_v50 = vld [vmem:[%s269_s2 + $0x10] sm:$0xff]  ;;  %v105_v56 = vld [vmem:[%s269_s2 + $0x8] sm:$0xff] }
   0x4   :  { %v50_v8 = vcvt.s32.f32 %v34_v2  ;;  %v51_v9 = vcvt.s32.f32 %v35_v3  ;;  %v48_v10 = vcvt.s32.f32 %v32_v4  ;;  %v49_v11 = vcvt.s32.f32 %v33_v5  ;;  %v104_v49 = vld [vmem:[%s269_s2] sm:$0xff]  ;;  %v107_v57 = vld [vmem:[%s269_s2 + $0x18] sm:$0xff]  ;;  %vm130_vm2 = vmand %vm128_vm0, %vm129_vm1 }
   0x5   :  { %v46_v16 = vcvt.s32.f32 %v30_v6  ;;  %v47_v17 = vcvt.s32.f32 %v31_v7  ;;  %v44_v19 = vcvt.s32.f32 %v28_v13  ;;  %v45_v20 = vcvt.s32.f32 %v29_v14  ;;  %v108_v55 = vld [vmem:[%s269_s2 + $0x20] sm:$0x1]  ;;  %v131_v62 = vld [vmem:[%s271_s4 + $0x10] sm:$0x1] }
   0x6   :  { %v59_v12 = vpack.c.bf16 %v51_v9, %v50_v8  ;;  %v58_v15 = vpack.c.bf16 %v49_v11, %v48_v10  ;;  %v26_v22 = vunpack.c.2.s8 %v17_v18  ;;  %v27_v23 = vunpack.c.3.s8 %v17_v18 }
   0x7   :  { %v57_v21 = vpack.c.bf16 %v47_v17, %v46_v16  ;;  %v56_v24 = vpack.c.bf16 %v45_v20, %v44_v19  ;;  %v24_v27 = vunpack.c.0.s8 %v17_v18  ;;  %v25_v28 = vunpack.c.1.s8 %v17_v18 }
   0x8   :  { %81 = vmatpush.bf16.msra.mxu0 %v59_v12  ;;  %163 = vmatpush.bf16.msra.mxu1 %v59_v12  ;;  %v42_v25 = vcvt.s32.f32 %v26_v22  ;;  %v43_v26 = vcvt.s32.f32 %v27_v23  ;;  %v22_v30 = vunpack.c.2.s8 %v16_v29  ;;  %v23_v34 = vunpack.c.3.s8 %v16_v29 }
   0x9   :  { %164 = vmatpush.bf16.msra.mxu2 %v59_v12  ;;  %v40_v32 = vcvt.s32.f32 %v24_v27  ;;  %v41_v33 = vcvt.s32.f32 %v25_v28  ;;  %v20_v35 = vunpack.c.0.s8 %v16_v29  ;;  %v21_v39 = vunpack.c.1.s8 %v16_v29 }
   0xa   :  { %v55_v31 = vpack.c.bf16 %v43_v26, %v42_v25  ;;  %v38_v37 = vcvt.s32.f32 %v22_v30  ;;  %v39_v38 = vcvt.s32.f32 %v23_v34  ;;  %v74_v45 = vunpack.c.l.b16 %v64_v43 }
   0xb   :  { %v54_v36 = vpack.c.bf16 %v41_v33, %v40_v32  ;;  %v36_v41 = vcvt.s32.f32 %v20_v35  ;;  %v37_v42 = vcvt.s32.f32 %v21_v39 }
   0xc   :  { %82 = vmatpush.bf16.msra.mxu0 %v58_v15  ;;  %165 = vmatpush.bf16.msra.mxu1 %v58_v15  ;;  %v53_v40 = vpack.c.bf16 %v39_v38, %v38_v37  ;;  %v77_v48 = vpack.c.b16 %v74_v45, %v74_v45 }
   0xd   :  { %166 = vmatpush.bf16.msra.mxu2 %v58_v15  ;;  %v52_v44 = vpack.c.bf16 %v37_v42, %v36_v41 }
  0x10   :  { %83 = vmatpush.bf16.msra.mxu0 %v57_v21  ;;  %167 = vmatpush.bf16.msra.mxu1 %v57_v21 }
  0x11   :  { %168 = vmatpush.bf16.msra.mxu2 %v57_v21 }
  0x14   :  { %84 = vmatpush.bf16.msra.mxu0 %v56_v24  ;;  %169 = vmatpush.bf16.msra.mxu1 %v56_v24 }
  0x15   :  { %170 = vmatpush.bf16.msra.mxu2 %v56_v24 }
  0x18   :  { %85 = vmatpush.bf16.msra.mxu0 %v55_v31  ;;  %171 = vmatpush.bf16.msra.mxu1 %v55_v31 }
  0x19   :  { %172 = vmatpush.bf16.msra.mxu2 %v55_v31 }
  0x1c   :  { %86 = vmatpush.bf16.msra.mxu0 %v54_v36  ;;  %173 = vmatpush.bf16.msra.mxu1 %v54_v36 }
  0x1d   :  { %174 = vmatpush.bf16.msra.mxu2 %v54_v36 }
  0x20   :  { %87 = vmatpush.bf16.msra.mxu0 %v53_v40  ;;  %175 = vmatpush.bf16.msra.mxu1 %v53_v40 }
  0x21   :  { %176 = vmatpush.bf16.msra.mxu2 %v53_v40 }
  0x24   :  { %88 = vmatpush.bf16.msra.mxu0 %v52_v44  ;;  %177 = vmatpush.bf16.msra.mxu1 %v52_v44 }
  0x25   :  { %178 = vmatpush.bf16.msra.mxu2 %v52_v44 }
  0x27   :  { %89 = vmatmul.bf16.vlgmr.msra.gmra.mxu0 %v150_v46  ;;  %94 = vmatmul.bf16.vlgmr.msra.gmra.mxu1 %v151_v47 }
  0x28   :  { %99 = vmatmul.bf16.vlgmr.msra.gmra.mxu2 %v77_v48 }
  0xa4   :  { %v90_v51 = vpop.f32.mrf.mxu0  ;;  %v95_v52 = vpop.f32.mrf.mxu1 }
  0xa5   :  { %v109_v53 = vsub.f32 %v90_v51, %v104_v49  ;;  %v111_v54 = vsub.f32 %v95_v52, %v106_v50 }
  0xa7   :  { %114 = vst [vmem:[%s270_s3] sm:$0xff] %v109_v53 }
  0xa8   :  { %116 = vst [vmem:[%s270_s3 + $0x10] sm:$0xff] %v111_v54 }
  0xab   :  { %v100_v58 = vpop.f32.mrf.mxu2 }
  0xac   :  { %v113_v59 = vsub.f32 %v100_v58, %v108_v55  ;;  %v92_v60 = vpop.f32.mrf.mxu0  ;;  %v97_v61 = vpop.f32.mrf.mxu1 }
  0xad   :  { %v110_v63 = vsub.f32 %v92_v60, %v105_v56  ;;  %v112_v0 = vsub.f32 %v97_v61, %v107_v57 }
  0xae   :  { %118 = vst [vmem:[%s270_s3 + $0x20] sm:$0x1] %v113_v59  ;;  %v123_v1 = vpack.c.bf16 %v113_v59, %v113_v59 }
  0xaf   :  { %115 = vst [vmem:[%s270_s3 + $0x8] sm:$0xff] %v110_v63  ;;  %v155_v2 = vpack.c.bf16 %v110_v63, %v109_v53  ;;  %v160_v3 = vpack.c.bf16 %v112_v0, %v111_v54 }
  0xb0   :  { %v132_v4 = vsel %vm130_vm2, %v123_v1, %v131_v62  ;;  %117 = vst [vmem:[%s270_s3 + $0x18] sm:$0xff] %v112_v0 }
  0xb1   :  { %133 = vst [vmem:[%s271_s4 + $0x10] sm:$0x1] %v132_v4 }
  0xb2   :  { %156 = vst [vmem:[%s271_s4] sm:$0xff] %v155_v2  }
  0xb3   :  { %162 = vst [vmem:[%s271_s4 + $0x8] sm:$0xff] %v160_v3   ;;  %v102_v5 = vpop.f32.mrf.mxu2 }

</bundles_post_ra>
